<compile_context>
chip_gen: v7x
topology: tpu7x:2x2x1
jax: 0.10.0
libtpu: 0.0.40
codegen_flags: <defaults>
</compile_context>

<pallas_src>
import math
import functools

import jax
import jax.numpy as jnp
from jax.experimental import pallas as pl
from jax.experimental.pallas import tpu as pltpu


_VMEM_LIMIT_BYTES = 48 * 1024 * 1024  # fits v5e/v6e (128 MiB) and v7x (64 MiB)


def _cdiv(a, b):
    return (a + b - 1) // b


def _round_up(a, b):
    return _cdiv(a, b) * b


# ---------------------------------------------------------------------------
# Pass 1: per-block ver/hor matmuls (no bias), accumulate elementwise
#         sum / sum-of-squares of the linear part per (hor_out, ver_out) slot.
#         One partial-stats block per core (megacore on v7x).
# ---------------------------------------------------------------------------
def _stats_kernel(x_ref, wvt_ref, wht_ref, s1_ref, s2_ref,
                  *, tm, hor_in, ver_out, hor_out):
    @pl.when(pl.program_id(1) == 0)
    def _init():
        s1_ref[...] = jnp.zeros_like(s1_ref)
        s2_ref[...] = jnp.zeros_like(s2_ref)

    # ver linear, flattened over samples: (tm*hor_in, ver_in) @ (ver_in, ver_out)
    t = jnp.dot(x_ref[...], wvt_ref[...], preferred_element_type=jnp.float32)
    # bring hor_in into lanes (minor-dim swap), then one big hor matmul
    t3 = jnp.swapaxes(t.reshape(tm, hor_in, ver_out), 1, 2)      # (tm, ver_out, hor_in)
    z = jnp.dot(t3.reshape(tm * ver_out, hor_in), wht_ref[...],
                preferred_element_type=jnp.float32)              # (tm*ver_out, hor_out)
    z3 = z.reshape(tm, ver_out, hor_out)

    # reduce only over the sample axis (pure VPU adds); lane/channel reduction
    # and bias folding happen once, outside the kernel.
    s1_ref[0] = s1_ref[0] + jnp.sum(z3, axis=0)                  # (ver_out, hor_out)
    s2_ref[0] = s2_ref[0] + jnp.sum(z3 * z3, axis=0)


# ---------------------------------------------------------------------------
# Pass 2: recompute the matmuls with the BN scale folded into W_hor and the
#         BN shift folded into the bias, apply ReLU, store lane-dense output.
# ---------------------------------------------------------------------------
def _apply_kernel(x_ref, wvt_ref, whts_ref, bs_ref, o_ref,
                  *, tm, hor_in, ver_out, hor_out):
    t = jnp.dot(x_ref[...], wvt_ref[...], preferred_element_type=jnp.float32)
    t3 = jnp.swapaxes(t.reshape(tm, hor_in, ver_out), 1, 2)      # (tm, ver_out, hor_in)
    z = jnp.dot(t3.reshape(tm * ver_out, hor_in), whts_ref[...],
                preferred_element_type=jnp.float32)              # (tm*ver_out, hor_out)
    y = jnp.swapaxes(z.reshape(tm, ver_out, hor_out), 1, 2)      # (tm, hor_out, ver_out)
    y = jnp.maximum(y + bs_ref[...], 0.0)
    o_ref[...] = y.reshape(tm, hor_out * ver_out).astype(o_ref.dtype)


# ---------------------------------------------------------------------------
# Wrapper
# ---------------------------------------------------------------------------
def ver_hor_bn_re(x, w_ver, w_hor, b, gamma, beta, eps=1e-5, block_rows=256):
    """x: (N, P, hor_in, ver_in) -> (N, P, hor_out, ver_out)."""
    N, P, hor_in, ver_in = x.shape
    ver_out = w_ver.shape[0]
    hor_out = w_hor.shape[0]
    M = N * P
    f32 = jnp.float32

    # ---- tiling: TM samples per grid step, optional 2-core split ----------
    tm = int(min(block_rows, _round_up(M, 8)))
    tm = max(8, (tm // 8) * 8)                       # keep sublane alignment
    nblk = _cdiv(M, tm)
    ncores = 2 if nblk >= 2 else 1                   # megacore split (v7x)
    nblk_pc = _cdiv(nblk, ncores)
    nblk_total = nblk_pc * ncores
    m_pad = nblk_total * tm

    # ---- lane-dense / flattened presentations (free reshapes) -------------
    x2 = x.reshape(M * hor_in, ver_in).astype(f32)   # rows = (sample, hor_in)
    if m_pad > M:                                    # zero rows contribute 0 to stats
        x2 = jnp.pad(x2, ((0, (m_pad - M) * hor_in), (0, 0)))
    wv_t = jnp.asarray(w_ver, f32).T                 # (ver_in, ver_out)
    wh = jnp.asarray(w_hor, f32)                     # (hor_out, hor_in)
    wh_t = wh.T                                      # (hor_in, hor_out)
    bb = jnp.asarray(b, f32)                         # (hor_out, ver_out)
    g = jnp.asarray(gamma, f32)
    bt = jnp.asarray(beta, f32)

    # ---- pass 1: BN statistics of the linear (bias-free) part -------------
    stats_kernel = functools.partial(
        _stats_kernel, tm=tm, hor_in=hor_in, ver_out=ver_out, hor_out=hor_out)
    s1p, s2p = pl.pallas_call(
        stats_kernel,
        out_shape=(
            jax.ShapeDtypeStruct((ncores, ver_out, hor_out), f32),
            jax.ShapeDtypeStruct((ncores, ver_out, hor_out), f32),
        ),
        grid=(ncores, nblk_pc),
        in_specs=[
            pl.BlockSpec((tm * hor_in, ver_in),
                         lambda c, i: (c * nblk_pc + i, 0)),
            pl.BlockSpec((ver_in, ver_out), lambda c, i: (0, 0)),
            pl.BlockSpec((hor_in, hor_out), lambda c, i: (0, 0)),
        ],
        out_specs=(
            pl.BlockSpec((1, ver_out, hor_out), lambda c, i: (c, 0, 0)),
            pl.BlockSpec((1, ver_out, hor_out), lambda c, i: (c, 0, 0)),
        ),
        compiler_params=pltpu.CompilerParams(
            dimension_semantics=("parallel", "arbitrary"),
            vmem_limit_bytes=_VMEM_LIMIT_BYTES),
    )(x2, wv_t, wh_t)

    # ---- host/XLA-side (tiny): fold bias in, finish BN stats, build scale/shift
    # Note: E[y^2]-E[y]^2 can cancel catastrophically for large means; f32 and
    # these magnitudes are fine, switch to a shifted formulation if needed.
    s1 = jnp.transpose(jnp.sum(s1p, axis=0))         # (hor_out, ver_out) sum of y-b
    s2 = jnp.transpose(jnp.sum(s2p, axis=0))         # (hor_out, ver_out) sum of (y-b)^2
    s1_full = s1 + M * bb                            # sum of y   (real samples only)
    s2_full = s2 + 2.0 * bb * s1 + M * (bb * bb)     # sum of y^2
    count = float(M * ver_out)                       # BN reduces over (N, P, ver_out)
    mean = jnp.sum(s1_full, axis=1) / count          # (hor_out,)
    var = jnp.sum(s2_full, axis=1) / count - mean * mean   # biased (training mode)
    inv = 1.0 / jnp.sqrt(var + eps)
    scale = g * inv                                  # (hor_out,)
    shift = bt - mean * scale                        # (hor_out,)
    wht_scaled = wh_t * scale[None, :]               # fold scale into hor weight
    b_scaled = scale[:, None] * bb + shift[:, None]  # fold scale/shift into bias

    # ---- pass 2: recompute matmuls + fused BN + ReLU, lane-dense output ---
    apply_kernel = functools.partial(
        _apply_kernel, tm=tm, hor_in=hor_in, ver_out=ver_out, hor_out=hor_out)
    out2 = pl.pallas_call(
        apply_kernel,
        out_shape=jax.ShapeDtypeStruct((m_pad, hor_out * ver_out), f32),
        grid=(nblk_total,),
        in_specs=[
            pl.BlockSpec((tm * hor_in, ver_in), lambda i: (i, 0)),
            pl.BlockSpec((ver_in, ver_out), lambda i: (0, 0)),
            pl.BlockSpec((hor_in, hor_out), lambda i: (0, 0)),
            pl.BlockSpec((hor_out, ver_out), lambda i: (0, 0)),
        ],
        out_specs=pl.BlockSpec((tm, hor_out * ver_out), lambda i: (i, 0)),
        compiler_params=pltpu.CompilerParams(
            dimension_semantics=("parallel",),
            vmem_limit_bytes=_VMEM_LIMIT_BYTES),
    )(x2, wv_t, wht_scaled, b_scaled)

    return out2[:M].reshape(N, P, hor_out, ver_out)


# ---------------------------------------------------------------------------
# Pure-JAX reference (for verification)
# ---------------------------------------------------------------------------
def ver_hor_bn_re_ref(x, w_ver, w_hor, b, gamma, beta, eps=1e-5):
    hp = jax.lax.Precision.HIGHEST
    t = jnp.einsum('nphv,wv->nphw', x, w_ver, precision=hp)        # ver linear
    y = jnp.einsum('oh,nphw->npow', w_hor, t, precision=hp) + b    # hor linear + bias
    mean = jnp.mean(y, axis=(0, 1, 3), keepdims=True)
    var = jnp.mean((y - mean) ** 2, axis=(0, 1, 3), keepdims=True)
    yn = (y - mean) / jnp.sqrt(var + eps)
    yn = yn * gamma.reshape(1, 1, -1, 1) + beta.reshape(1, 1, -1, 1)
    return jnp.maximum(yn, 0.0)


if __name__ == "__main__":
    # small shapes consistent with the module
    N, P = 2, 8
    ver_in, ver_out = 32, 32
    hor_in, hor_out = 16, 16

    key = jax.random.PRNGKey(0)
    kx, kv, kh, kb, kg, kbt = jax.random.split(key, 6)

    x = jax.random.normal(kx, (N, P, hor_in, ver_in), dtype=jnp.float32)

    # deterministic parameter init (shapes per nn.Linear / nn.Parameter in __init__)
    w_ver = jax.random.normal(kv, (ver_out, ver_in), jnp.float32) / math.sqrt(ver_in)
    w_hor = jax.random.normal(kh, (hor_out, hor_in), jnp.float32) / math.sqrt(hor_in)
    b_std = math.sqrt(2.0) * math.sqrt(2.0 / (ver_out + hor_out))
    b = jax.random.normal(kb, (hor_out, ver_out), jnp.float32) * b_std
    gamma = 1.0 + 0.1 * jax.random.normal(kg, (hor_out,), jnp.float32)
    beta = 0.1 * jax.random.normal(kbt, (hor_out,), jnp.float32)

    out = ver_hor_bn_re(x, w_ver, w_hor, b, gamma, beta)
    out = jax.block_until_ready(out)

    ref = ver_hor_bn_re_ref(x, w_ver, w_hor, b, gamma, beta)
    assert out.shape == (N, P, hor_out, ver_out)
    err = float(jnp.max(jnp.abs(out - ref)))
    assert jnp.allclose(out, ref, rtol=1e-4, atol=1e-4), f"max abs err {err}"

    print("KERNEL_OK")
</pallas_src>

<mosaic_0001>
module attributes {stable_mosaic.version = 11 : i64} {
  func.func @_stats_kernel(%arg0: i32, %arg1: i32, %arg2: memref<256x32xf32, #tpu.memory_space<vmem>>, %arg3: memref<32x32xf32, #tpu.memory_space<vmem>>, %arg4: memref<16x16xf32, #tpu.memory_space<vmem>>, %arg5: memref<1x32x16xf32, #tpu.memory_space<vmem>>, %arg6: memref<1x32x16xf32, #tpu.memory_space<vmem>>) attributes {dimension_semantics = [#tpu.dimension_semantics<parallel>, #tpu.dimension_semantics<arbitrary>], iteration_bounds = array<i64: 1, 1>, scalar_prefetch = 0 : i64, scratch_operands = 0 : i64, tpu.core_type = #tpu.core_type<tc>, window_params = [{transform_indices = @transform_0, window_bounds = array<i64: 256, 32>}, {pipeline_mode = #tpu.pipeline_mode<synchronous>, transform_indices = @transform_1, window_bounds = array<i64: 32, 32>}, {pipeline_mode = #tpu.pipeline_mode<synchronous>, transform_indices = @transform_2, window_bounds = array<i64: 16, 16>}, {transform_indices = @transform_3, window_bounds = array<i64: 1, 32, 16>}, {transform_indices = @transform_4, window_bounds = array<i64: 1, 32, 16>}]} {
    %c0_i32 = arith.constant 0 : i32
    %0 = arith.cmpi eq, %arg1, %c0_i32 : i32
    %1 = arith.extui %0 : i1 to i32
    %c0_i32_0 = arith.constant 0 : i32
    %2 = arith.cmpi ne, %1, %c0_i32_0 : i32
    scf.if %2 {
      %cst_21 = arith.constant 0.000000e+00 : f32
      %27 = vector.broadcast %cst_21 : f32 to vector<1x32x16xf32>
      %c0_22 = arith.constant 0 : index
      %c0_23 = arith.constant 0 : index
      %c0_24 = arith.constant 0 : index
      %28 = vector.load %arg5[%c0_22, %c0_23, %c0_24] : memref<1x32x16xf32, #tpu.memory_space<vmem>>, vector<1x32x16xf32>
      tpu.vector_store %arg5[%c0_22, %c0_23, %c0_24], %27 {strides = array<i32>} : memref<1x32x16xf32, #tpu.memory_space<vmem>>, vector<1x32x16xf32>,
      %cst_25 = arith.constant 0.000000e+00 : f32
      %29 = vector.broadcast %cst_25 : f32 to vector<1x32x16xf32>
      %c0_26 = arith.constant 0 : index
      %c0_27 = arith.constant 0 : index
      %c0_28 = arith.constant 0 : index
      %30 = vector.load %arg6[%c0_26, %c0_27, %c0_28] : memref<1x32x16xf32, #tpu.memory_space<vmem>>, vector<1x32x16xf32>
      tpu.vector_store %arg6[%c0_26, %c0_27, %c0_28], %29 {strides = array<i32>} : memref<1x32x16xf32, #tpu.memory_space<vmem>>, vector<1x32x16xf32>,
    } else {
    }
    %c0 = arith.constant 0 : index
    %c0_1 = arith.constant 0 : index
    %3 = vector.load %arg2[%c0, %c0_1] : memref<256x32xf32, #tpu.memory_space<vmem>>, vector<256x32xf32>
    %c0_2 = arith.constant 0 : index
    %c0_3 = arith.constant 0 : index
    %4 = vector.load %arg3[%c0_2, %c0_3] : memref<32x32xf32, #tpu.memory_space<vmem>>, vector<32x32xf32>
    %cst = arith.constant dense<0.000000e+00> : vector<256x32xf32>
    %5 = tpu.matmul %3, %4, %cst {dimension_numbers = #tpu.dot_dimension_numbers<[1], [0], [0], [1], [0, 0, 1, 1], [], []>} : vector<256x32xf32>, vector<32x32xf32>, vector<256x32xf32> -> vector<256x32xf32>
    %6 = vector.shape_cast %5 : vector<256x32xf32> to vector<16x16x32xf32>
    %7 = tpu.transpose %6, [0, 2, 1] : vector<16x16x32xf32> -> vector<16x32x16xf32>
    %8 = vector.shape_cast %7 : vector<16x32x16xf32> to vector<512x16xf32>
    %c0_4 = arith.constant 0 : index
    %c0_5 = arith.constant 0 : index
    %9 = vector.load %arg4[%c0_4, %c0_5] : memref<16x16xf32, #tpu.memory_space<vmem>>, vector<16x16xf32>
    %cst_6 = arith.constant dense<0.000000e+00> : vector<512x16xf32>
    %10 = tpu.matmul %8, %9, %cst_6 {dimension_numbers = #tpu.dot_dimension_numbers<[1], [0], [0], [1], [0, 0, 1, 1], [], []>} : vector<512x16xf32>, vector<16x16xf32>, vector<512x16xf32> -> vector<512x16xf32>
    %11 = vector.shape_cast %10 : vector<512x16xf32> to vector<16x32x16xf32>
    %c0_7 = arith.constant 0 : index
    %c0_8 = arith.constant 0 : index
    %c0_9 = arith.constant 0 : index
    %12 = vector.load %arg5[%c0_7, %c0_8, %c0_9] : memref<1x32x16xf32, #tpu.memory_space<vmem>>, vector<1x32x16xf32>
    %13 = vector.shape_cast %12 : vector<1x32x16xf32> to vector<32x16xf32>
    %cst_10 = arith.constant dense<0.000000e+00> : vector<32x16xf32>
    %14 = vector.multi_reduction <add>, %11, %cst_10 [0] : vector<16x32x16xf32> to vector<32x16xf32>
    %15 = arith.addf %13, %14 : vector<32x16xf32>
    %c0_11 = arith.constant 0 : index
    %c0_12 = arith.constant 0 : index
    %c0_13 = arith.constant 0 : index
    %16 = vector.load %arg5[%c0_11, %c0_12, %c0_13] : memref<1x32x16xf32, #tpu.memory_space<vmem>>, vector<1x32x16xf32>
    %17 = vector.shape_cast %16 : vector<1x32x16xf32> to vector<32x16xf32>
    %18 = vector.shape_cast %15 : vector<32x16xf32> to vector<1x32x16xf32>
    tpu.vector_store %arg5[%c0_11, %c0_12, %c0_13], %18 {strides = array<i32>} : memref<1x32x16xf32, #tpu.memory_space<vmem>>, vector<1x32x16xf32>,
    %c0_14 = arith.constant 0 : index
    %c0_15 = arith.constant 0 : index
    %c0_16 = arith.constant 0 : index
    %19 = vector.load %arg6[%c0_14, %c0_15, %c0_16] : memref<1x32x16xf32, #tpu.memory_space<vmem>>, vector<1x32x16xf32>
    %20 = vector.shape_cast %19 : vector<1x32x16xf32> to vector<32x16xf32>
    %21 = arith.mulf %11, %11 : vector<16x32x16xf32>
    %cst_17 = arith.constant dense<0.000000e+00> : vector<32x16xf32>
    %22 = vector.multi_reduction <add>, %21, %cst_17 [0] : vector<16x32x16xf32> to vector<32x16xf32>
    %23 = arith.addf %20, %22 : vector<32x16xf32>
    %c0_18 = arith.constant 0 : index
    %c0_19 = arith.constant 0 : index
    %c0_20 = arith.constant 0 : index
    %24 = vector.load %arg6[%c0_18, %c0_19, %c0_20] : memref<1x32x16xf32, #tpu.memory_space<vmem>>, vector<1x32x16xf32>
    %25 = vector.shape_cast %24 : vector<1x32x16xf32> to vector<32x16xf32>
    %26 = vector.shape_cast %23 : vector<32x16xf32> to vector<1x32x16xf32>
    tpu.vector_store %arg6[%c0_18, %c0_19, %c0_20], %26 {strides = array<i32>} : memref<1x32x16xf32, #tpu.memory_space<vmem>>, vector<1x32x16xf32>,
    return
  }
  func.func @transform_0(%arg0: i32, %arg1: i32) -> (i32, i32) {
    %c1_i32 = arith.constant 1 : i32
    %0 = arith.muli %arg0, %c1_i32 : i32
    %1 = arith.addi %0, %arg1 : i32
    %c0_i32 = arith.constant 0 : i32
    %c0_i32_0 = arith.constant 0 : i32
    return %1, %c0_i32 : i32, i32
  }
  func.func @transform_1(%arg0: i32, %arg1: i32) -> (i32, i32) {
    %c0_i32 = arith.constant 0 : i32
    %c0_i32_0 = arith.constant 0 : i32
    %c0_i32_1 = arith.constant 0 : i32
    return %c0_i32, %c0_i32_0 : i32, i32
  }
  func.func @transform_2(%arg0: i32, %arg1: i32) -> (i32, i32) {
    %c0_i32 = arith.constant 0 : i32
    %c0_i32_0 = arith.constant 0 : i32
    %c0_i32_1 = arith.constant 0 : i32
    return %c0_i32, %c0_i32_0 : i32, i32
  }
  func.func @transform_3(%arg0: i32, %arg1: i32) -> (i32, i32, i32) {
    %c0_i32 = arith.constant 0 : i32
    %c0_i32_0 = arith.constant 0 : i32
    %c0_i32_1 = arith.constant 0 : i32
    return %arg0, %c0_i32, %c0_i32_0 : i32, i32, i32
  }
  func.func @transform_4(%arg0: i32, %arg1: i32) -> (i32, i32, i32) {
    %c0_i32 = arith.constant 0 : i32
    %c0_i32_0 = arith.constant 0 : i32
    %c0_i32_1 = arith.constant 0 : i32
    return %arg0, %c0_i32, %c0_i32_0 : i32, i32, i32
  }
}

</mosaic_0001>

<bundles_post_ra>
// kernel: tpu_custom_call.1
= control target key start
LH: loop header
LB: loop body
LE: loop exit
PB: predicated region body
PF: predicated region fallthrough
CT: control target
= control target key end

     0   :  { %vm87_vm0 = vcmask 261120   ;;  %vm42_vm1 = vcmask 130048   ;;  %s3019_s1 = inlined_call_operand.vmem [shape: f32[32,32], index: 1, kind: input, shape index: {}]   ;;  %s3020_s0 = inlined_call_operand.vmem [shape: f32[256,32], index: 0, kind: input, shape index: {}]   ;;  %s3021_s2 = inlined_call_operand.vmem [shape: f32[16,16], index: 2, kind: input, shape index: {}]   ;;  %s3022_s3 = inlined_call_operand.vmem [shape: f32[1,32,16], index: 3, kind: output, shape index: {0}]   ;;  %s3023_s4 = inlined_call_operand.vmem [shape: f32[1,32,16], index: 4, kind: output, shape index: {1}]  }
   0x1   :  { %v83_v0 = vld [vmem:[%s3019_s1] sm:$0xff]  ;;  %v84_v1 = vld [vmem:[%s3019_s1 + $0x8] sm:$0xff]  ;;  %v85_v2 = vld [vmem:[%s3019_s1 + $0x10] sm:$0xff] }
   0x2   :  { %v2205_v3 = vpack.c.bf16 %v84_v1, %v83_v0  ;;  %v86_v4 = vld [vmem:[%s3019_s1 + $0x18] sm:$0xff]  ;;  %v51_v5 = vld [vmem:[%s3020_s0] sm:$0xff]  ;;  %v52_v7 = vld [vmem:[%s3020_s0 + $0x8] sm:$0xff] }
   0x3   :  { %v2209_v6 = vpack.c.bf16 %v86_v4, %v85_v2  ;;  %2057 = vmatprep.mubr.msk.f32.mxu0 %vm87_vm0, %v51_v5  ;;  %v53_v8 = vld [vmem:[%s3020_s0 + $0x10] sm:$0xff]  ;;  %v54_v9 = vld [vmem:[%s3020_s0 + $0x18] sm:$0xff]  ;;  %v55_v10 = vld [vmem:[%s3020_s0 + $0x20] sm:$0xff] }
   0x4   :  { %2206 = vmatprep.subr.bf16.mxu0 %v2205_v3  ;;  %v56_v11 = vld [vmem:[%s3020_s0 + $0x28] sm:$0xff]  ;;  %v57_v12 = vld [vmem:[%s3020_s0 + $0x30] sm:$0xff]  ;;  %v58_v13 = vld [vmem:[%s3020_s0 + $0x38] sm:$0xff] }
   0x5   :  { %2208 = vmatpush3.bf16.msra.mxu0 %v2205_v3  ;;  %v59_v14 = vld [vmem:[%s3020_s0 + $0x40] sm:$0xff]  ;;  %v60_v15 = vld [vmem:[%s3020_s0 + $0x48] sm:$0xff]  ;;  %v61_v16 = vld [vmem:[%s3020_s0 + $0x50] sm:$0xff] }
   0x6   :  { %2210 = vmatprep.subr.bf16.mxu0 %v2209_v6  ;;  %v62_v17 = vld [vmem:[%s3020_s0 + $0x58] sm:$0xff]  ;;  %v63_v18 = vld [vmem:[%s3020_s0 + $0x60] sm:$0xff]  ;;  %v64_v19 = vld [vmem:[%s3020_s0 + $0x68] sm:$0xff] }
   0x7   :  { %v65_v20 = vld [vmem:[%s3020_s0 + $0x70] sm:$0xff]  ;;  %v66_v21 = vld [vmem:[%s3020_s0 + $0x78] sm:$0xff]  ;;  %v67_v22 = vld [vmem:[%s3020_s0 + $0x80] sm:$0xff] }
   0x8   :  { %v68_v23 = vld [vmem:[%s3020_s0 + $0x88] sm:$0xff]  ;;  %v69_v24 = vld [vmem:[%s3020_s0 + $0x90] sm:$0xff]  ;;  %v70_v25 = vld [vmem:[%s3020_s0 + $0x98] sm:$0xff] }
   0x9   :  { %2212 = vmatpush3.bf16.msra.mxu0 %v2209_v6  ;;  %v71_v26 = vld [vmem:[%s3020_s0 + $0xa0] sm:$0xff]  ;;  %v72_v27 = vld [vmem:[%s3020_s0 + $0xa8] sm:$0xff]  ;;  %v73_v28 = vld [vmem:[%s3020_s0 + $0xb0] sm:$0xff] }
   0xa   :  { %v74_v29 = vld [vmem:[%s3020_s0 + $0xb8] sm:$0xff]  ;;  %v75_v30 = vld [vmem:[%s3020_s0 + $0xc0] sm:$0xff]  ;;  %v76_v31 = vld [vmem:[%s3020_s0 + $0xc8] sm:$0xff] }
   0xb   :  { %v77_v32 = vld [vmem:[%s3020_s0 + $0xd0] sm:$0xff]  ;;  %v78_v33 = vld [vmem:[%s3020_s0 + $0xd8] sm:$0xff]  ;;  %v79_v34 = vld [vmem:[%s3020_s0 + $0xe0] sm:$0xff] }
   0xc   :  { %2058 = vmatmul.mubr.msk.f32.vlgmr.msra.gmra.mrb[0].mxu0 %vm87_vm0, %v52_v7  ;;  %v80_v35 = vld [vmem:[%s3020_s0 + $0xe8] sm:$0xff]  ;;  %v81_v36 = vld [vmem:[%s3020_s0 + $0xf0] sm:$0xff]  ;;  %v82_v37 = vld [vmem:[%s3020_s0 + $0xf8] sm:$0xff] }
   0xd   :  { %2060 = vmatprep.mubr.msk.f32.mxu0 %vm87_vm0, %v53_v8  ;;  %v921_v49 = vld [vmem:[%s3021_s2] sm:$0xff]  ;;  %v922_v50 = vld [vmem:[%s3021_s2 + $0x8] sm:$0xff] }
   0xe   :  { %v2213_v52 = vpack.c.bf16 %v922_v50, %v921_v49 }
  0x10   :  { %2061 = vmatmul.mubr.msk.f32.gmra.mrb[2].mxu0 %vm87_vm0, %v54_v9  ;;  %2217 = vmatprep.subr.bf16.mxu1 %v2213_v52 }
  0x11   :  { %2063 = vmatprep.mubr.msk.f32.mxu0 %vm87_vm0, %v55_v10  ;;  %2214 = vmatprep.subr.bf16.mxu0 %v2213_v52 }
  0x12   :  { %2218 = vmatpush3.bf16.msra.mxu1 %v2213_v52  ;;  %2216 = vmatpush3.bf16.msra.mxu0 %v2213_v52 }
  0x14   :  { %2064 = vmatmul.mubr.msk.f32.gmra.mrb[4].mxu0 %vm87_vm0, %v56_v11 }
  0x15   :  { %2066 = vmatprep.mubr.msk.f32.mxu0 %vm87_vm0, %v57_v12 }
  0x18   :  { %2067 = vmatmul.mubr.msk.f32.gmra.mrb[6].mxu0 %vm87_vm0, %v58_v13 }
  0x19   :  { %2069 = vmatprep.mubr.msk.f32.mxu0 %vm87_vm0, %v59_v14 }
  0x1c   :  { %2070 = vmatmul.mubr.msk.f32.gmra.mrb[8].mxu0 %vm87_vm0, %v60_v15 }
  0x1d   :  { %2072 = vmatprep.mubr.msk.f32.mxu0 %vm87_vm0, %v61_v16 }
  0x20   :  { %2073 = vmatmul.mubr.msk.f32.gmra.mrb[10].mxu0 %vm87_vm0, %v62_v17 }
  0x21   :  { %2075 = vmatprep.mubr.msk.f32.mxu0 %vm87_vm0, %v63_v18 }
  0x24   :  { %2076 = vmatmul.mubr.msk.f32.gmra.mrb[12].mxu0 %vm87_vm0, %v64_v19 }
  0x25   :  { %2078 = vmatprep.mubr.msk.f32.mxu0 %vm87_vm0, %v65_v20 }
  0x28   :  { %2079 = vmatmul.mubr.msk.f32.gmra.mrb[14].mxu0 %vm87_vm0, %v66_v21 }
  0x29   :  { %2081 = vmatprep.mubr.msk.f32.mxu0 %vm87_vm0, %v67_v22 }
  0x2c   :  { %2082 = vmatmul.mubr.msk.f32.gmra.mrb[16].mxu0 %vm87_vm0, %v68_v23 }
  0x2d   :  { %2084 = vmatprep.mubr.msk.f32.mxu0 %vm87_vm0, %v69_v24 }
  0x30   :  { %2085 = vmatmul.mubr.msk.f32.gmra.mrb[18].mxu0 %vm87_vm0, %v70_v25 }
  0x31   :  { %2087 = vmatprep.mubr.msk.f32.mxu0 %vm87_vm0, %v71_v26 }
  0x34   :  { %2088 = vmatmul.mubr.msk.f32.gmra.mrb[20].mxu0 %vm87_vm0, %v72_v27 }
  0x35   :  { %2090 = vmatprep.mubr.msk.f32.mxu0 %vm87_vm0, %v73_v28 }
  0x38   :  { %2091 = vmatmul.mubr.msk.f32.gmra.mrb[22].mxu0 %vm87_vm0, %v74_v29 }
  0x39   :  { %2093 = vmatprep.mubr.msk.f32.mxu0 %vm87_vm0, %v75_v30 }
  0x3c   :  { %2094 = vmatmul.mubr.msk.f32.gmra.mrb[24].mxu0 %vm87_vm0, %v76_v31 }
  0x3d   :  { %2096 = vmatprep.mubr.msk.f32.mxu0 %vm87_vm0, %v77_v32 }
  0x40   :  { %2097 = vmatmul.mubr.msk.f32.gmra.mrb[26].mxu0 %vm87_vm0, %v78_v33 }
  0x41   :  { %2099 = vmatprep.mubr.msk.f32.mxu0 %vm87_vm0, %v79_v34 }
  0x44   :  { %2100 = vmatmul.mubr.msk.f32.gmra.mrb[28].mxu0 %vm87_vm0, %v80_v35 }
  0x45   :  { %2102 = vmatprep.mubr.msk.f32.mxu0 %vm87_vm0, %v81_v36 }
  0x48   :  { %2103 = vmatmul.mubr.msk.f32.gmra.mrb[30].mxu0 %vm87_vm0, %v82_v37 }
  0xdf   :  { %v2059_v38 = vpop.f32.mrb[0].mxu0 }
  0xe0   :  { %v250_v39 = vpop.f32.mrb[1].mxu0 }
  0xe3   :  { %v2062_v40 = vpop.f32.mrb[2].mxu0 }
  0xe4   :  { %v260_v41 = vpop.f32.mrb[3].mxu0 }
  0xe7   :  { %v2065_v42 = vpop.f32.mrb[4].mxu0 }
  0xe8   :  { %v270_v43 = vpop.f32.mrb[5].mxu0 }
  0xeb   :  { %v2068_v44 = vpop.f32.mrb[6].mxu0 }
  0xec   :  { %v280_v45 = vpop.f32.mrb[7].mxu0 }
  0xed   :  { %505 = vxpose.xlu0.b32.start [1/2] (short) (narrow) %v280_v45, 32 }
  0xef   :  { %v2071_v46 = vpop.f32.mrb[8].mxu0 }
  0xf0   :  { %v290_v47 = vpop.f32.mrb[9].mxu0 }
  0xf1   :  { %506 = vxpose.xlu0.b32.end [2/2] (short) (narrow) %v2068_v44, 32  ;;  %537 = vxpose.xlu1.b32.start [1/2] (short) (narrow) %v290_v47, 32 }
  0xf3   :  { %v2074_v48 = vpop.f32.mrb[10].mxu0 }
  0xf4   :  { %v300_v51 = vpop.f32.mrb[11].mxu0 }
  0xf5   :  { %538 = vxpose.xlu1.b32.end [2/2] (short) (narrow) %v2071_v46, 32 }
  0xf7   :  { %v2077_v53 = vpop.f32.mrb[12].mxu0 }
  0xf8   :  { %v310_v54 = vpop.f32.mrb[13].mxu0 }
  0xfa   :  { %569 = vxpose.xlu0.b32.start [1/2] (short) (narrow) %v300_v51, 32 }
  0xfb   :  { %v2080_v55 = vpop.f32.mrb[14].mxu0 }
  0xfc   :  { %v320_v56 = vpop.f32.mrb[15].mxu0 }
  0xfe   :  { %570 = vxpose.xlu0.b32.end [2/2] (short) (narrow) %v2074_v48, 32  ;;  %601 = vxpose.xlu1.b32.start [1/2] (short) (narrow) %v310_v54, 32 }
  0xff   :  { %v2083_v57 = vpop.f32.mrb[16].mxu0 }
 0x100   :  { %v330_v58 = vpop.f32.mrb[17].mxu0 }
 0x102   :  { %602 = vxpose.xlu1.b32.end [2/2] (short) (narrow) %v2077_v53, 32 }
 0x103   :  { %v2086_v59 = vpop.f32.mrb[18].mxu0 }
 0x104   :  { %v340_v60 = vpop.f32.mrb[19].mxu0 }
 0x107   :  { %633 = vxpose.xlu0.b32.start [1/2] (short) (narrow) %v320_v56, 32  ;;  %v2089_v61 = vpop.f32.mrb[20].mxu0 }
 0x108   :  { %v350_v62 = vpop.f32.mrb[21].mxu0 }
 0x10b   :  { %665 = vxpose.xlu1.b32.start [1/2] (short) (narrow) %v330_v58, 32  ;;  %634 = vxpose.xlu0.b32.end [2/2] (short) (narrow) %v2080_v55, 32  ;;  %v2092_v63 = vpop.f32.mrb[22].mxu0 }
 0x10c   :  { %v360_v0 = vpop.f32.mrb[23].mxu0 }
 0x10f   :  { %666 = vxpose.xlu1.b32.end [2/2] (short) (narrow) %v2083_v57, 32  ;;  %v2095_v1 = vpop.f32.mrb[24].mxu0 }
 0x110   :  { %v370_v2 = vpop.f32.mrb[25].mxu0 }
 0x113   :  { %v2098_v3 = vpop.f32.mrb[26].mxu0 }
 0x114   :  { %697 = vxpose.xlu0.b32.start [1/2] (short) (narrow) %v340_v60, 32  ;;  %v380_v4 = vpop.f32.mrb[27].mxu0 }
 0x117   :  { %v2101_v5 = vpop.f32.mrb[28].mxu0 }
 0x118   :  { %409 = vxpose.xlu1.b32.start [1/2] (short) (narrow) %v250_v39, 32  ;;  %698 = vxpose.xlu0.b32.end [2/2] (short) (narrow) %v2086_v59, 32  ;;  %v390_v6 = vpop.f32.mrb[29].mxu0 }
 0x11b   :  { %v2104_v7 = vpop.f32.mrb[30].mxu0 }
 0x11c   :  { %410 = vxpose.xlu1.b32.end [2/2] (short) (narrow) %v2059_v38, 32  ;;  %v400_v8 = vpop.f32.mrb[31].mxu0 }
 0x121   :  { %729 = vxpose.xlu0.b32.start [1/2] (short) (narrow) %v350_v62, 32 }
 0x125   :  { %441 = vxpose.xlu1.b32.start [1/2] (short) (narrow) %v260_v41, 32  ;;  %730 = vxpose.xlu0.b32.end [2/2] (short) (narrow) %v2089_v61, 32 }
 0x129   :  { %442 = vxpose.xlu1.b32.end [2/2] (short) (narrow) %v2062_v40, 32 }
 0x12e   :  { %761 = vxpose.xlu0.b32.start [1/2] (short) (narrow) %v360_v0, 32 }
 0x132   :  { %473 = vxpose.xlu1.b32.start [1/2] (short) (narrow) %v270_v43, 32  ;;  %762 = vxpose.xlu0.b32.end [2/2] (short) (narrow) %v2092_v63, 32 }
 0x136   :  { %474 = vxpose.xlu1.b32.end [2/2] (short) (narrow) %v2065_v42, 32 }
 0x13b   :  { %793 = vxpose.xlu0.b32.start [1/2] (short) (narrow) %v370_v2, 32 }
 0x13f   :  { %794 = vxpose.xlu0.b32.end [2/2] (short) (narrow) %v2095_v1, 32  ;;  %825 = vxpose.xlu1.b32.start [1/2] (short) (narrow) %v380_v4, 32 }
 0x143   :  { %826 = vxpose.xlu1.b32.end [2/2] (short) (narrow) %v2098_v3, 32 }
 0x148   :  { %857 = vxpose.xlu0.b32.start [1/2] (short) (narrow) %v390_v6, 32 }
 0x14c   :  { %858 = vxpose.xlu0.b32.end [2/2] (short) (narrow) %v2101_v5, 32  ;;  %889 = vxpose.xlu1.b32.start [1/2] (short) (narrow) %v400_v8, 32 }
 0x150   :  { %890 = vxpose.xlu1.b32.end [2/2] (short) (narrow) %v2104_v7, 32 }
 0x16d   :  { %v2392_v9 = vpop.trf.xlu0 }
 0x171   :  { %v2394_v10 = vpop.trf.xlu0  ;;  %v553_v11 = vpop.trf.xlu1 }
 0x175   :  { %v523_v12 = vpop.trf.xlu0  ;;  %v554_v13 = vpop.trf.xlu1 }
 0x176   :  { %2130 = vmatprep.mubr.msk.f32.mxu1 %vm42_vm1, %v523_v12 }
 0x179   :  { %v524_v14 = vpop.trf.xlu0  ;;  %v555_v15 = vpop.trf.xlu1 }
 0x17a   :  { %2131 = vmatmul.mubr.msk.f32.vlgmr.msra.gmra.mrb[0].mxu1 %vm42_vm1, %v524_v14 }
 0x17b   :  { %2133 = vmatprep.mubr.msk.f32.mxu1 %vm42_vm1, %v553_v11 }
 0x17d   :  { %v556_v16 = vpop.trf.xlu1  ;;  %v585_v17 = vpop.trf.xlu0 }
 0x17e   :  { %2134 = vmatmul.mubr.msk.f32.gmra.mrb[2].mxu1 %vm42_vm1, %v554_v13 }
 0x17f   :  { %2136 = vmatprep.mubr.msk.f32.mxu1 %vm42_vm1, %v555_v15 }
 0x181   :  { %v586_v18 = vpop.trf.xlu0  ;;  %v617_v19 = vpop.trf.xlu1 }
 0x182   :  { %2137 = vmatmul.mubr.msk.f32.gmra.mrb[4].mxu1 %vm42_vm1, %v556_v16 }
 0x183   :  { %2139 = vmatprep.mubr.msk.f32.mxu1 %vm42_vm1, %v585_v17 }
 0x185   :  { %v587_v20 = vpop.trf.xlu0  ;;  %v618_v21 = vpop.trf.xlu1 }
 0x186   :  { %2140 = vmatmul.mubr.msk.f32.gmra.mrb[6].mxu1 %vm42_vm1, %v586_v18 }
 0x187   :  { %2142 = vmatprep.mubr.msk.f32.mxu1 %vm42_vm1, %v587_v20 }
 0x189   :  { %v588_v22 = vpop.trf.xlu0  ;;  %v619_v23 = vpop.trf.xlu1 }
 0x18a   :  { %2143 = vmatmul.mubr.msk.f32.gmra.mrb[8].mxu1 %vm42_vm1, %v588_v22 }
 0x18b   :  { %2145 = vmatprep.mubr.msk.f32.mxu1 %vm42_vm1, %v617_v19 }
 0x18d   :  { %v620_v24 = vpop.trf.xlu1  ;;  %v649_v25 = vpop.trf.xlu0 }
 0x18e   :  { %2146 = vmatmul.mubr.msk.f32.gmra.mrb[10].mxu1 %vm42_vm1, %v618_v21 }
 0x18f   :  { %2148 = vmatprep.mubr.msk.f32.mxu1 %vm42_vm1, %v619_v23 }
 0x191   :  { %v650_v26 = vpop.trf.xlu0  ;;  %v681_v27 = vpop.trf.xlu1 }
 0x192   :  { %2149 = vmatmul.mubr.msk.f32.gmra.mrb[12].mxu1 %vm42_vm1, %v620_v24 }
 0x193   :  { %2151 = vmatprep.mubr.msk.f32.mxu1 %vm42_vm1, %v649_v25 }
 0x195   :  { %v651_v28 = vpop.trf.xlu0  ;;  %v682_v29 = vpop.trf.xlu1 }
 0x196   :  { %2152 = vmatmul.mubr.msk.f32.gmra.mrb[14].mxu1 %vm42_vm1, %v650_v26 }
 0x197   :  { %2154 = vmatprep.mubr.msk.f32.mxu1 %vm42_vm1, %v651_v28 }
 0x199   :  { %v652_v30 = vpop.trf.xlu0  ;;  %v683_v31 = vpop.trf.xlu1 }
 0x19a   :  { %2155 = vmatmul.mubr.msk.f32.gmra.mrb[16].mxu1 %vm42_vm1, %v652_v30 }
 0x19b   :  { %2157 = vmatprep.mubr.msk.f32.mxu1 %vm42_vm1, %v681_v27 }
 0x19d   :  { %v684_v32 = vpop.trf.xlu1  ;;  %v713_v33 = vpop.trf.xlu0 }
 0x19e   :  { %2158 = vmatmul.mubr.msk.f32.gmra.mrb[18].mxu1 %vm42_vm1, %v682_v29 }
 0x19f   :  { %2160 = vmatprep.mubr.msk.f32.mxu1 %vm42_vm1, %v683_v31 }
 0x1a1   :  { %v425_v34 = vpop.trf.xlu1  ;;  %v714_v35 = vpop.trf.xlu0 }
 0x1a2   :  { %2161 = vmatmul.mubr.msk.f32.gmra.mrb[20].mxu1 %vm42_vm1, %v684_v32  ;;  %2109 = vmatprep.mubr.msk.f32.mxu0 %vm42_vm1, %v425_v34 }
 0x1a3   :  { %2163 = vmatprep.mubr.msk.f32.mxu1 %vm42_vm1, %v713_v33 }
 0x1a5   :  { %v426_v36 = vpop.trf.xlu1  ;;  %v715_v37 = vpop.trf.xlu0 }
 0x1a6   :  { %2164 = vmatmul.mubr.msk.f32.gmra.mrb[22].mxu1 %vm42_vm1, %v714_v35  ;;  %2110 = vmatmul.mubr.msk.f32.vlgmr.msra.gmra.mrb[32].mxu0 %vm42_vm1, %v426_v36 }
 0x1a7   :  { %2166 = vmatprep.mubr.msk.f32.mxu1 %vm42_vm1, %v715_v37 }
 0x1a9   :  { %v427_v38 = vpop.trf.xlu1  ;;  %v716_v39 = vpop.trf.xlu0 }
 0x1aa   :  { %2167 = vmatmul.mubr.msk.f32.gmra.mrb[24].mxu1 %vm42_vm1, %v716_v39  ;;  %2112 = vmatprep.mubr.msk.f32.mxu0 %vm42_vm1, %v427_v38 }
 0x1ad   :  { %v428_v40 = vpop.trf.xlu1  ;;  %v745_v41 = vpop.trf.xlu0 }
 0x1ae   :  { %2169 = vmatprep.mubr.msk.f32.mxu1 %vm42_vm1, %v745_v41  ;;  %2113 = vmatmul.mubr.msk.f32.gmra.mrb[34].mxu0 %vm42_vm1, %v428_v40 }
 0x1b1   :  { %v457_v42 = vpop.trf.xlu1  ;;  %v746_v43 = vpop.trf.xlu0 }
 0x1b2   :  { %2170 = vmatmul.mubr.msk.f32.gmra.mrb[26].mxu1 %vm42_vm1, %v746_v43  ;;  %2115 = vmatprep.mubr.msk.f32.mxu0 %vm42_vm1, %v457_v42 }
 0x1b5   :  { %v458_v44 = vpop.trf.xlu1  ;;  %v747_v45 = vpop.trf.xlu0 }
 0x1b6   :  { %2116 = vmatmul.mubr.msk.f32.gmra.mrb[36].mxu0 %vm42_vm1, %v458_v44  ;;  %2172 = vmatprep.mubr.msk.f32.mxu1 %vm42_vm1, %v747_v45 }
 0x1b9   :  { %v459_v46 = vpop.trf.xlu1  ;;  %v748_v47 = vpop.trf.xlu0 }
 0x1ba   :  { %2173 = vmatmul.mubr.msk.f32.gmra.mrb[28].mxu1 %vm42_vm1, %v748_v47  ;;  %2118 = vmatprep.mubr.msk.f32.mxu0 %vm42_vm1, %v459_v46 }
 0x1bd   :  { %v460_v48 = vpop.trf.xlu1  ;;  %v777_v49 = vpop.trf.xlu0 }
 0x1be   :  { %2119 = vmatmul.mubr.msk.f32.gmra.mrb[38].mxu0 %vm42_vm1, %v460_v48  ;;  %2175 = vmatprep.mubr.msk.f32.mxu1 %vm42_vm1, %v777_v49 }
 0x1c1   :  { %v489_v50 = vpop.trf.xlu1  ;;  %v778_v51 = vpop.trf.xlu0 }
 0x1c2   :  { %2176 = vmatmul.mubr.msk.f32.gmra.mrb[30].mxu1 %vm42_vm1, %v778_v51  ;;  %2121 = vmatprep.mubr.msk.f32.mxu0 %vm42_vm1, %v489_v50 }
 0x1c5   :  { %v490_v52 = vpop.trf.xlu1  ;;  %v779_v53 = vpop.trf.xlu0 }
 0x1c6   :  { %2122 = vmatmul.mubr.msk.f32.gmra.mrb[40].mxu0 %vm42_vm1, %v490_v52  ;;  %2178 = vmatprep.mubr.msk.f32.mxu1 %vm42_vm1, %v779_v53 }
 0x1c9   :  { %v491_v54 = vpop.trf.xlu1  ;;  %v780_v55 = vpop.trf.xlu0 }
 0x1ca   :  { %2179 = vmatmul.mubr.msk.f32.gmra.mrb[32].mxu1 %vm42_vm1, %v780_v55  ;;  %2124 = vmatprep.mubr.msk.f32.mxu0 %vm42_vm1, %v491_v54 }
 0x1cd   :  { %v492_v56 = vpop.trf.xlu1  ;;  %v809_v57 = vpop.trf.xlu0 }
 0x1ce   :  { %2125 = vmatmul.mubr.msk.f32.gmra.mrb[42].mxu0 %vm42_vm1, %v492_v56  ;;  %2181 = vmatprep.mubr.msk.f32.mxu1 %vm42_vm1, %v809_v57 }
 0x1cf   :  { %2127 = vmatprep.mubr.msk.f32.mxu0 %vm42_vm1, %v2392_v9  ;;  %v2220_v9 = vmov 0.0  }
 0x1d0   :  { %44 = vst.msk [vmem:[%s3022_s3 + $0x8] sm:$0xff] %vm42_vm1, %v2220_v9  ;;  %43 = vst.msk [vmem:[%s3022_s3] sm:$0xff] %vm42_vm1, %v2220_v9 }
 0x1d1   :  { %v810_v58 = vpop.trf.xlu0  ;;  %v841_v59 = vpop.trf.xlu1  ;;  %45 = vst.msk [vmem:[%s3022_s3 + $0x10] sm:$0xff] %vm42_vm1, %v2220_v9  ;;  %46 = vst.msk [vmem:[%s3022_s3 + $0x18] sm:$0xff] %vm42_vm1, %v2220_v9 }
 0x1d2   :  { %2128 = vmatmul.mubr.msk.f32.gmra.mrb[44].mxu0 %vm42_vm1, %v2394_v10  ;;  %2182 = vmatmul.mubr.msk.f32.gmra.mrb[34].mxu1 %vm42_vm1, %v810_v58  ;;  %48 = vst.msk [vmem:[%s3023_s4 + $0x8] sm:$0xff] %vm42_vm1, %v2220_v9  ;;  %47 = vst.msk [vmem:[%s3023_s4] sm:$0xff] %vm42_vm1, %v2220_v9 }
 0x1d3   :  { %49 = vst.msk [vmem:[%s3023_s4 + $0x10] sm:$0xff] %vm42_vm1, %v2220_v9  ;;  %50 = vst.msk [vmem:[%s3023_s4 + $0x18] sm:$0xff] %vm42_vm1, %v2220_v9 }
 0x1d5   :  { %v811_v60 = vpop.trf.xlu0  ;;  %v842_v61 = vpop.trf.xlu1 }
 0x1d6   :  { %2184 = vmatprep.mubr.msk.f32.mxu1 %vm42_vm1, %v811_v60 }
 0x1d9   :  { %v812_v62 = vpop.trf.xlu0  ;;  %v843_v63 = vpop.trf.xlu1 }
 0x1da   :  { %2185 = vmatmul.mubr.msk.f32.gmra.mrb[36].mxu1 %vm42_vm1, %v812_v62 }
 0x1db   :  { %2187 = vmatprep.mubr.msk.f32.mxu1 %vm42_vm1, %v841_v59 }
 0x1dd   :  { %v873_v0 = vpop.trf.xlu0  ;;  %v844_v1 = vpop.trf.xlu1 }
 0x1de   :  { %2188 = vmatmul.mubr.msk.f32.gmra.mrb[38].mxu1 %vm42_vm1, %v842_v61 }
 0x1df   :  { %2190 = vmatprep.mubr.msk.f32.mxu1 %vm42_vm1, %v843_v63 }
 0x1e1   :  { %v874_v2 = vpop.trf.xlu0  ;;  %v905_v3 = vpop.trf.xlu1 }
 0x1e2   :  { %2191 = vmatmul.mubr.msk.f32.gmra.mrb[40].mxu1 %vm42_vm1, %v844_v1 }
 0x1e3   :  { %2193 = vmatprep.mubr.msk.f32.mxu1 %vm42_vm1, %v873_v0 }
 0x1e5   :  { %v875_v4 = vpop.trf.xlu0  ;;  %v906_v5 = vpop.trf.xlu1 }
 0x1e6   :  { %2194 = vmatmul.mubr.msk.f32.gmra.mrb[42].mxu1 %vm42_vm1, %v874_v2 }
 0x1e7   :  { %2196 = vmatprep.mubr.msk.f32.mxu1 %vm42_vm1, %v875_v4 }
 0x1e9   :  { %v876_v6 = vpop.trf.xlu0  ;;  %v907_v7 = vpop.trf.xlu1 }
 0x1ea   :  { %2197 = vmatmul.mubr.msk.f32.gmra.mrb[44].mxu1 %vm42_vm1, %v876_v6 }
 0x1eb   :  { %2199 = vmatprep.mubr.msk.f32.mxu1 %vm42_vm1, %v905_v3 }
 0x1ed   :  { %v908_v8 = vpop.trf.xlu1 }
 0x1ee   :  { %2200 = vmatmul.mubr.msk.f32.gmra.mrb[46].mxu1 %vm42_vm1, %v906_v5 }
 0x1ef   :  { %2202 = vmatprep.mubr.msk.f32.mxu1 %vm42_vm1, %v907_v7 }
 0x1f2   :  { %2203 = vmatmul.mubr.msk.f32.gmra.mrb[48].mxu1 %vm42_vm1, %v908_v8 }
 0x24d   :  { %v2132_v10 = vpop.f32.mrb[0].mxu1 }
 0x24e   :  { %v1252_v11 = vpop.f32.mrb[1].mxu1  ;;  %v1656_v36 = vmul.f32 %v2132_v10, %v2132_v10  ;;  %v2521_v42 = vsel %vm42_vm1, %v2132_v10, 0.0 }
 0x24f   :  { %v1655_v37 = vmul.f32 %v1252_v11, %v1252_v11  ;;  %v2524_v43 = vsel %vm42_vm1, %v1252_v11, 0.0 }
 0x250   :  { %v2527_v44 = vsel %vm42_vm1, %v1656_v36, 0.0 }
 0x251   :  { %v2135_v12 = vpop.f32.mrb[2].mxu1  ;;  %v2530_v45 = vsel %vm42_vm1, %v1655_v37, 0.0 }
 0x252   :  { %v1262_v13 = vpop.f32.mrb[3].mxu1  ;;  %v1658_v40 = vmul.f32 %v2135_v12, %v2135_v12  ;;  %v2535_v49 = vsel %vm42_vm1, %v2135_v12, 0.0 }
 0x253   :  { %v1657_v41 = vmul.f32 %v1262_v13, %v1262_v13  ;;  %v2538_v50 = vsel %vm42_vm1, %v1262_v13, 0.0 }
 0x254   :  { %v2543_v54 = vsel %vm42_vm1, %v1658_v40, 0.0 }
 0x255   :  { %v2138_v14 = vpop.f32.mrb[4].mxu1  ;;  %v2546_v55 = vsel %vm42_vm1, %v1657_v41, 0.0 }
 0x256   :  { %v1272_v15 = vpop.f32.mrb[5].mxu1  ;;  %v1660_v46 = vmul.f32 %v2138_v14, %v2138_v14  ;;  %3024 = vst [vmem:[#allocation2_spill] sm:$0xff] %v2546_v55  ;;  %v2549_v58 = vsel %vm42_vm1, %v2138_v14, 0.0 }
 0x257   :  { %v1659_v47 = vmul.f32 %v1272_v15, %v1272_v15  ;;  %v2552_v59 = vsel %vm42_vm1, %v1272_v15, 0.0 }
 0x258   :  { %v2555_v62 = vsel %vm42_vm1, %v1660_v46, 0.0 }
 0x259   :  { %v2141_v16 = vpop.f32.mrb[6].mxu1  ;;  %v2558_v63 = vsel %vm42_vm1, %v1659_v47, 0.0 }
 0x25a   :  { %v1282_v17 = vpop.f32.mrb[7].mxu1  ;;  %v1662_v51 = vmul.f32 %v2141_v16, %v2141_v16  ;;  %v2561_v0 = vsel %vm42_vm1, %v2141_v16, 0.0 }
 0x25b   :  { %v1661_v52 = vmul.f32 %v1282_v17, %v1282_v17  ;;  %v2564_v1 = vsel %vm42_vm1, %v1282_v17, 0.0 }
 0x25c   :  { %v2569_v3 = vsel %vm42_vm1, %v1662_v51, 0.0 }
 0x25d   :  { %v2144_v18 = vpop.f32.mrb[8].mxu1  ;;  %v2572_v4 = vsel %vm42_vm1, %v1661_v52, 0.0 }
 0x25e   :  { %v1292_v19 = vpop.f32.mrb[9].mxu1  ;;  %v1664_v56 = vmul.f32 %v2144_v18, %v2144_v18  ;;  %3025 = vst [vmem:[#allocation3_spill] sm:$0xff] %v2572_v4  ;;  %v2575_v5 = vsel %vm42_vm1, %v2144_v18, 0.0 }
 0x25f   :  { %v1663_v57 = vmul.f32 %v1292_v19, %v1292_v19  ;;  %v2578_v6 = vsel %vm42_vm1, %v1292_v19, 0.0 }
 0x260   :  { %v2583_v8 = vsel %vm42_vm1, %v1664_v56, 0.0 }
 0x261   :  { %v2147_v20 = vpop.f32.mrb[10].mxu1  ;;  %v2586_v9 = vsel %vm42_vm1, %v1663_v57, 0.0 }
 0x262   :  { %v1302_v21 = vpop.f32.mrb[11].mxu1  ;;  %v1666_v60 = vmul.f32 %v2147_v20, %v2147_v20  ;;  %v2589_v10 = vsel %vm42_vm1, %v2147_v20, 0.0 }
 0x263   :  { %v1665_v61 = vmul.f32 %v1302_v21, %v1302_v21  ;;  %v2592_v11 = vsel %vm42_vm1, %v1302_v21, 0.0 }
 0x264   :  { %3026 = vst [vmem:[#allocation4_spill] sm:$0xff] %v2592_v11  ;;  %v2595_v12 = vsel %vm42_vm1, %v1666_v60, 0.0 }
 0x265   :  { %v2150_v22 = vpop.f32.mrb[12].mxu1  ;;  %v2598_v13 = vsel %vm42_vm1, %v1665_v61, 0.0 }
 0x266   :  { %v2494_v23 = vpop.f32.mrb[13].mxu1  ;;  %3027 = vst [vmem:[#allocation5_spill] sm:$0xff] %v2598_v13  ;;  %v2601_v14 = vsel %vm42_vm1, %v2150_v22, 0.0  ;;  %v1668_v16 = vmul.f32 %v2150_v22, %v2150_v22 }
 0x267   :  { %v1667_v17 = vmul.f32 %v2494_v23, %v2494_v23 }
 0x269   :  { %v2496_v24 = vpop.f32.mrb[14].mxu1 }
 0x26a   :  { %v2498_v25 = vpop.f32.mrb[15].mxu1  ;;  %v1670_v18 = vmul.f32 %v2496_v24, %v2496_v24 }
 0x26b   :  { %v1669_v21 = vmul.f32 %v2498_v25, %v2498_v25 }
 0x26d   :  { %v2500_v26 = vpop.f32.mrb[16].mxu1 }
 0x26e   :  { %v2502_v27 = vpop.f32.mrb[17].mxu1  ;;  %v1672_v52 = vmul.f32 %v2500_v26, %v2500_v26 }
 0x271   :  { %v2504_v28 = vpop.f32.mrb[18].mxu1 }
 0x272   :  { %v2506_v29 = vpop.f32.mrb[19].mxu1 }
 0x275   :  { %v2508_v30 = vpop.f32.mrb[20].mxu1 }
 0x276   :  { %v2510_v31 = vpop.f32.mrb[21].mxu1 }
 0x279   :  { %v2512_v32 = vpop.f32.mrb[22].mxu1  ;;  %v2111_v33 = vpop.f32.mrb[32].mxu0 }
 0x27a   :  { %v2514_v34 = vpop.f32.mrb[23].mxu1  ;;  %v1182_v35 = vpop.f32.mrb[33].mxu0  ;;  %v1642_v15 = vmul.f32 %v2111_v33, %v2111_v33  ;;  %v1536_v36 = vsel %vm42_vm1, %v2111_v33, 0.0  ;;  %v2623_v33 = vsel %vm42_vm1, %v2494_v23, 0.0 }
 0x27b   :  { %v1641_v19 = vmul.f32 %v1182_v35, %v1182_v35  ;;  %v1505_v46 = vsel %vm42_vm1, %v1182_v35, 0.0 }
 0x27c   :  { %v1736_v56 = vsel %vm42_vm1, %v1642_v15, 0.0  ;;  %v2635_v15 = vsel %vm42_vm1, %v1667_v17, 0.0  ;;  %v2657_v17 = vsel %vm42_vm1, %v2500_v26, 0.0  ;;  %v1673_v26 = vmul.f32 %v2506_v29, %v2506_v29 }
 0x27d   :  { %v2516_v38 = vpop.f32.mrb[24].mxu1  ;;  %v1705_v35 = vsel %vm42_vm1, %v1641_v19, 0.0  ;;  %v2646_v19 = vsel %vm42_vm1, %v1670_v18, 0.0  ;;  %v1671_v18 = vmul.f32 %v2502_v27, %v2502_v27 }
 0x27e   :  { %v2518_v39 = vpop.f32.mrb[25].mxu1  ;;  %3028 = vst [vmem:[#allocation6_spill] sm:$0xff] %v2646_v19 }
 0x281   :  { %v2532_v48 = vpop.f32.mrb[34].mxu0 }
 0x282   :  { %v2540_v53 = vpop.f32.mrb[35].mxu0 }
 0x283   :  { %v1567_v13 = vsel %vm42_vm1, %v2540_v53, 0.0 }
 0x285   :  { %v2566_v2 = vpop.f32.mrb[26].mxu1 }
 0x286   :  { %v2580_v7 = vpop.f32.mrb[27].mxu1 }
 0x289   :  { %v2117_v20 = vpop.f32.mrb[36].mxu0 }
 0x28a   :  { %v1537_v37 = vsel %vm42_vm1, %v2117_v20, 0.0  ;;  %v1646_v40 = vmul.f32 %v2117_v20, %v2117_v20  ;;  %v1202_v41 = vpop.f32.mrb[37].mxu0 }
 0x28b   :  { %v2612_v22 = vadd.f32 %v1537_v37, %v1536_v36  ;;  %v1506_v47 = vsel %vm42_vm1, %v1202_v41, 0.0  ;;  %v1645_v51 = vmul.f32 %v1202_v41, %v1202_v41  ;;  %v2632_v37 = vsel %vm42_vm1, %v1668_v16, 0.0 }
 0x28c   :  { %v1737_v57 = vsel %vm42_vm1, %v1646_v40, 0.0  ;;  %v2619_v60 = vadd.f32 %v1506_v47, %v1505_v46  ;;  %v2639_v40 = vsel %vm42_vm1, %v2496_v24, 0.0  ;;  %v2650_v46 = vsel %vm42_vm1, %v2498_v25, 0.0 }
 0x28d   :  { %v2626_v61 = vadd.f32 %v1737_v57, %v1736_v56  ;;  %v1706_v20 = vsel %vm42_vm1, %v1645_v51, 0.0  ;;  %v2629_v36 = vpop.f32.mrb[28].mxu1  ;;  %3029 = vst [vmem:[#allocation7_spill] sm:$0xff] %v2650_v46  ;;  %v2653_v16 = vsel %vm42_vm1, %v1669_v21, 0.0  ;;  %v2660_v24 = vsel %vm42_vm1, %v1672_v52, 0.0 }
 0x28e   :  { %v2641_v23 = vadd.f32 %v1706_v20, %v1705_v35  ;;  %v2643_v41 = vpop.f32.mrb[29].mxu1  ;;  %3030 = vst [vmem:[#allocation8_spill] sm:$0xff] %v2653_v16  ;;  %3031 = vst [vmem:[#allocation9_spill] sm:$0xff] %v2660_v24  ;;  %v2664_v47 = vsel %vm42_vm1, %v2502_v27, 0.0  ;;  %v1644_v25 = vmul.f32 %v2532_v48, %v2532_v48  ;;  %v1674_v21 = vmul.f32 %v2504_v28, %v2504_v28 }
 0x28f   :  { %3032 = vst [vmem:[#allocation10_spill] sm:$0xff] %v2664_v47  ;;  %v1676_v51 = vmul.f32 %v2508_v30, %v2508_v30  ;;  %v1643_v52 = vmul.f32 %v2540_v53, %v2540_v53  ;;  %v1675_v57 = vmul.f32 %v2510_v31, %v2510_v31  ;;  %v1598_v27 = vsel %vm42_vm1, %v2532_v48, 0.0 }
 0x290   :  { %v1678_v24 = vmul.f32 %v2512_v32, %v2512_v32  ;;  %v1798_v11 = vsel %vm42_vm1, %v1644_v25, 0.0  ;;  %v2705_v25 = vsel %vm42_vm1, %v2504_v28, 0.0  ;;  %v2725_v28 = vsel %vm42_vm1, %v2510_v31, 0.0 }
 0x291   :  { %v2120_v56 = vpop.f32.mrb[38].mxu0  ;;  %v1767_v19 = vsel %vm42_vm1, %v1643_v52, 0.0  ;;  %3036 = vst [vmem:[#allocation14_spill] sm:$0xff] %v2725_v28 }
 0x292   :  { %v1599_v35 = vsel %vm42_vm1, %v2120_v56, 0.0  ;;  %v1648_v20 = vmul.f32 %v2120_v56, %v2120_v56  ;;  %v1212_v16 = vpop.f32.mrb[39].mxu0  ;;  %v1677_v56 = vmul.f32 %v2514_v34, %v2514_v34 }
 0x293   :  { %v2685_v46 = vadd.f32 %v1599_v35, %v1598_v27  ;;  %v1568_v4 = vsel %vm42_vm1, %v1212_v16, 0.0  ;;  %v1647_v47 = vmul.f32 %v1212_v16, %v1212_v16  ;;  %v2701_v16 = vsel %vm42_vm1, %v1671_v18, 0.0 }
 0x294   :  { %v1799_v55 = vsel %vm42_vm1, %v1648_v20, 0.0  ;;  %v2692_v48 = vadd.f32 %v1568_v4, %v1567_v13  ;;  %3033 = vst [vmem:[#allocation11_spill] sm:$0xff] %v2701_v16  ;;  %v2709_v4 = vsel %vm42_vm1, %v2506_v29, 0.0  ;;  %v2728_v29 = vsel %vm42_vm1, %v1676_v51, 0.0 }
 0x295   :  { %v2697_v53 = vadd.f32 %v1799_v55, %v1798_v11  ;;  %v1768_v27 = vsel %vm42_vm1, %v1647_v47, 0.0  ;;  %v2177_v35 = vpop.f32.mrb[30].mxu1  ;;  %3034 = vst [vmem:[#allocation12_spill] sm:$0xff] %v2709_v4  ;;  %v2714_v55 = vsel %vm42_vm1, %v1674_v21, 0.0  ;;  %v2717_v11 = vsel %vm42_vm1, %v1673_v26, 0.0 }
 0x296   :  { %v2711_v13 = vadd.f32 %v1768_v27, %v1767_v19  ;;  %v1402_v20 = vpop.f32.mrb[31].mxu1  ;;  %3035 = vst [vmem:[#allocation13_spill] sm:$0xff] %v2717_v11  ;;  %v2721_v47 = vsel %vm42_vm1, %v2508_v30, 0.0  ;;  %v2731_v19 = vsel %vm42_vm1, %v1675_v57, 0.0  ;;  %v2735_v18 = vsel %vm42_vm1, %v2512_v32, 0.0 }
 0x297   :  { %3037 = vst [vmem:[#allocation15_spill] sm:$0xff] %v2731_v19  ;;  %v2739_v21 = vsel %vm42_vm1, %v2514_v34, 0.0  ;;  %v2742_v30 = vsel %vm42_vm1, %v1678_v24, 0.0  ;;  %v2745_v31 = vsel %vm42_vm1, %v1677_v56, 0.0  ;;  %v2749_v26 = vsel %vm42_vm1, %v2516_v38, 0.0 }
 0x298   :  { %3038 = vst [vmem:[#allocation16_spill] sm:$0xff] %v2739_v21  ;;  %3039 = vst [vmem:[#allocation17_spill] sm:$0xff] %v2742_v30  ;;  %v1680_v51 = vmul.f32 %v2516_v38, %v2516_v38  ;;  %v1679_v32 = vmul.f32 %v2518_v39, %v2518_v39  ;;  %v1682_v34 = vmul.f32 %v2566_v2, %v2566_v2  ;;  %v2764_v38 = vsel %vm42_vm1, %v2518_v39, 0.0 }
 0x299   :  { %3040 = vst [vmem:[#allocation18_spill] sm:$0xff] %v2745_v31  ;;  %v2123_v52 = vpop.f32.mrb[40].mxu0  ;;  %v1681_v56 = vmul.f32 %v2580_v7, %v2580_v7  ;;  %3041 = vst [vmem:[#allocation19_spill] sm:$0xff] %v2764_v38  ;;  %v1684_v16 = vmul.f32 %v2629_v36, %v2629_v36  ;;  %v1686_v30 = vmul.f32 %v2177_v35, %v2177_v35 }
 0x29a   :  { %v1539_v24 = vsel %vm42_vm1, %v2123_v52, 0.0  ;;  %v1650_v57 = vmul.f32 %v2123_v52, %v2123_v52  ;;  %v1222_v27 = vpop.f32.mrb[41].mxu0  ;;  %v2773_v4 = vsel %vm42_vm1, %v1680_v51, 0.0  ;;  %v2780_v38 = vsel %vm42_vm1, %v1679_v32, 0.0 }
 0x29b   :  { %v1540_v31 = vadd.f32 %v1539_v24, %v2612_v22  ;;  %v1508_v19 = vsel %vm42_vm1, %v1222_v27, 0.0  ;;  %v1649_v11 = vmul.f32 %v1222_v27, %v1222_v27  ;;  %v1683_v22 = vmul.f32 %v2643_v41, %v2643_v41  ;;  %3042 = vst [vmem:[#allocation20_spill] sm:$0xff] %v2780_v38 }
 0x29c   :  { %v1739_v21 = vsel %vm42_vm1, %v1650_v57, 0.0  ;;  %v2770_v52 = vadd.f32 %v1508_v19, %v2619_v60  ;;  %v1685_v28 = vmul.f32 %v1402_v20, %v1402_v20  ;;  %v2787_v19 = vsel %vm42_vm1, %v2566_v2, 0.0 }
 0x29d   :  { %v1740_v24 = vadd.f32 %v1739_v21, %v2626_v61  ;;  %v1708_v27 = vsel %vm42_vm1, %v1649_v11, 0.0  ;;  %v2180_v39 = vpop.f32.mrb[32].mxu1  ;;  %v2790_v51 = vsel %vm42_vm1, %v1682_v34, 0.0  ;;  %v2794_v61 = vsel %vm42_vm1, %v2580_v7, 0.0 }
 0x29e   :  { %v2783_v57 = vadd.f32 %v1708_v27, %v2641_v23  ;;  %v1412_v60 = vpop.f32.mrb[33].mxu1  ;;  %3043 = vst [vmem:[#allocation21_spill] sm:$0xff] %v2794_v61  ;;  %v2797_v11 = vsel %vm42_vm1, %v1681_v56, 0.0  ;;  %v2801_v21 = vsel %vm42_vm1, %v2629_v36, 0.0  ;;  %v2804_v23 = vsel %vm42_vm1, %v1684_v16, 0.0 }
 0x29f   :  { %3044 = vst [vmem:[#allocation22_spill] sm:$0xff] %v2797_v11  ;;  %v2808_v2 = vsel %vm42_vm1, %v2643_v41, 0.0  ;;  %v1688_v32 = vmul.f32 %v2180_v39, %v2180_v39  ;;  %v2811_v34 = vsel %vm42_vm1, %v1683_v22, 0.0  ;;  %v2814_v7 = vsel %vm42_vm1, %v2177_v35, 0.0 }
 0x2a0   :  { %3045 = vst [vmem:[#allocation23_spill] sm:$0xff] %v2811_v34  ;;  %v2817_v56 = vsel %vm42_vm1, %v1402_v20, 0.0  ;;  %v1687_v27 = vmul.f32 %v1412_v60, %v1412_v60  ;;  %v2820_v11 = vsel %vm42_vm1, %v1686_v30, 0.0  ;;  %v2823_v16 = vsel %vm42_vm1, %v1685_v28, 0.0 }
 0x2a1   :  { %3046 = vst [vmem:[#allocation24_spill] sm:$0xff] %v2817_v56  ;;  %v2126_v36 = vpop.f32.mrb[42].mxu0  ;;  %3047 = vst [vmem:[#allocation25_spill] sm:$0xff] %v2820_v11  ;;  %v2827_v22 = vsel %vm42_vm1, %v2180_v39, 0.0  ;;  %v2832_v56 = vsel %vm42_vm1, %v1688_v32, 0.0  ;;  %v2835_v30 = vsel %vm42_vm1, %v1412_v60, 0.0 }
 0x2a2   :  { %3048 = vst [vmem:[#allocation26_spill] sm:$0xff] %v2823_v16  ;;  %v1601_v41 = vsel %vm42_vm1, %v2126_v36, 0.0  ;;  %v1652_v38 = vmul.f32 %v2126_v36, %v2126_v36  ;;  %v1232_v61 = vpop.f32.mrb[43].mxu0  ;;  %3049 = vst [vmem:[#allocation27_spill] sm:$0xff] %v2832_v56  ;;  %v2840_v36 = vsel %vm42_vm1, %v1687_v27, 0.0 }
 0x2a3   :  { %v1602_v35 = vadd.f32 %v1601_v41, %v2685_v46  ;;  %v1570_v20 = vsel %vm42_vm1, %v1232_v61, 0.0  ;;  %v1651_v34 = vmul.f32 %v1232_v61, %v1232_v61  ;;  %3050 = vst [vmem:[#allocation28_spill] sm:$0xff] %v2835_v30 }
 0x2a4   :  { %v1801_v28 = vsel %vm42_vm1, %v1652_v38, 0.0  ;;  %v1571_v16 = vadd.f32 %v1570_v20, %v2692_v48 }
 0x2a5   :  { %v1604_v39 = vadd.f32 %v2521_v42, %v1602_v35  ;;  %v1802_v46 = vadd.f32 %v1801_v28, %v2697_v53  ;;  %v1770_v41 = vsel %vm42_vm1, %v1651_v34, 0.0  ;;  %v2129_v61 = vpop.f32.mrb[44].mxu0  ;;  %v2183_v11 = vpop.f32.mrb[34].mxu1 }
 0x2a6   :  { %v1573_v32 = vadd.f32 %v2524_v43, %v1571_v16  ;;  %v1771_v60 = vadd.f32 %v1770_v41, %v2711_v13  ;;  %v1541_v30 = vsel %vm42_vm1, %v2129_v61, 0.0  ;;  %v1654_v38 = vmul.f32 %v2129_v61, %v2129_v61  ;;  %v1242_v56 = vpop.f32.mrb[45].mxu0  ;;  %v1422_v48 = vpop.f32.mrb[35].mxu1 }
 0x2a7   :  { %v1606_v27 = vadd.f32 %v2549_v58, %v1604_v39  ;;  %v1804_v20 = vadd.f32 %v2527_v44, %v1802_v46  ;;  %v1542_v42 = vadd.f32 %v1541_v30, %v1540_v31  ;;  %v2851_v53 = vsel %vm42_vm1, %v2183_v11, 0.0 }
 0x2a8   :  { %v1575_v34 = vadd.f32 %v2552_v59, %v1573_v32  ;;  %v1773_v35 = vadd.f32 %v2530_v45, %v1771_v60  ;;  %v1741_v43 = vsel %vm42_vm1, %v1654_v38, 0.0  ;;  %v1690_v13 = vmul.f32 %v2183_v11, %v2183_v11  ;;  %v3051_v38 = vld [vmem:[#allocation6_spill] sm:$0xff] }
 0x2a9   :  { %v1608_v16 = vadd.f32 %v2575_v5, %v1606_v27  ;;  %v1806_v28 = vadd.f32 %v2555_v62, %v1804_v20  ;;  %v1544_v41 = vadd.f32 %v2535_v49, %v1542_v42  ;;  %v1742_v58 = vadd.f32 %v1741_v43, %v1740_v24  ;;  %v3052_v20 = vld [vmem:[#allocation2_spill] sm:$0xff] }
 0x2aa   :  { %v1577_v44 = vadd.f32 %v2578_v6, %v1575_v34  ;;  %v1775_v31 = vadd.f32 %v2558_v63, %v1773_v35  ;;  %v2862_v30 = vsel %vm42_vm1, %v1690_v13, 0.0  ;;  %v1510_v59 = vsel %vm42_vm1, %v1242_v56, 0.0  ;;  %v3055_v43 = vld [vmem:[#allocation10_spill] sm:$0xff] }
 0x2ab   :  { %v1610_v45 = vadd.f32 %v2601_v14, %v1608_v16  ;;  %v1808_v11 = vadd.f32 %v2583_v8, %v1806_v28  ;;  %v1546_v5 = vadd.f32 %v2561_v0, %v1544_v41  ;;  %v1744_v62 = vadd.f32 %v2543_v54, %v1742_v58  ;;  %v3056_v58 = vld [vmem:[#allocation3_spill] sm:$0xff] }
 0x2ac   :  { %v1579_v49 = vadd.f32 %v2623_v33, %v1577_v44  ;;  %v1777_v24 = vadd.f32 %v2586_v9, %v1775_v31  ;;  %v1511_v6 = vadd.f32 %v1510_v59, %v2770_v52  ;;  %v1653_v63 = vmul.f32 %v1242_v56, %v1242_v56  ;;  %v3057_v31 = vld [vmem:[#allocation7_spill] sm:$0xff] }
 0x2ad   :  { %v1810_v39 = vadd.f32 %v2632_v37, %v1808_v11  ;;  %v1548_v46 = vadd.f32 %v2589_v10, %v1546_v5  ;;  %v1746_v61 = vadd.f32 %v2569_v3, %v1744_v62  ;;  %v2876_v14 = vsel %vm42_vm1, %v1422_v48, 0.0  ;;  %v2186_v8 = vpop.f32.mrb[36].mxu1 }
 0x2ae   :  { %v1779_v0 = vadd.f32 %v2635_v15, %v1777_v24  ;;  %v1513_v54 = vadd.f32 %v2538_v50, %v1511_v6  ;;  %v1710_v33 = vsel %vm42_vm1, %v1653_v63, 0.0  ;;  %v1689_v9 = vmul.f32 %v1422_v48, %v1422_v48  ;;  %v1432_v32 = vpop.f32.mrb[37].mxu1  ;;  %v3060_v6 = vld [vmem:[#allocation5_spill] sm:$0xff] }
 0x2af   :  { %v1550_v52 = vadd.f32 %v2639_v40, %v1548_v46  ;;  %v1748_v37 = vadd.f32 %v2595_v12, %v1746_v61  ;;  %v1711_v10 = vadd.f32 %v1710_v33, %v2783_v57  ;;  %v1612_v3 = vadd.f32 %v2657_v17, %v1610_v45  ;;  %v3053_v57 = vld [vmem:[#allocation4_spill] sm:$0xff]  ;;  %v3054_v17 = vld [vmem:[#allocation9_spill] sm:$0xff]  ;;  %v3058_v45 = vld [vmem:[#allocation14_spill] sm:$0xff] }
 0x2b0   :  { %v1515_v56 = vadd.f32 %v2564_v1, %v1513_v54  ;;  %v2887_v60 = vsel %vm42_vm1, %v1689_v9, 0.0  ;;  %v1621_v15 = vsel %vm42_vm1, %v2186_v8, 0.0  ;;  %v1692_v50 = vmul.f32 %v2186_v8, %v2186_v8  ;;  %v3062_v61 = vld [vmem:[#allocation19_spill] sm:$0xff] }
 0x2b1   :  { %v1750_v27 = vadd.f32 %v3051_v38, %v1748_v37  ;;  %v1552_v48 = vadd.f32 %v2705_v25, %v1550_v52  ;;  %v1713_v40 = vadd.f32 %v3052_v20, %v1711_v10  ;;  %v1614_v12 = vadd.f32 %v2721_v47, %v1612_v3  ;;  %v2189_v42 = vpop.f32.mrb[38].mxu1  ;;  %v3064_v10 = vld [vmem:[#allocation16_spill] sm:$0xff] }
 0x2b2   :  { %v1517_v34 = vadd.f32 %v3053_v57, %v1515_v56  ;;  %v1812_v35 = vadd.f32 %v3054_v17, %v1810_v39  ;;  %v1821_v1 = vsel %vm42_vm1, %v1692_v50, 0.0  ;;  %v1581_v13 = vadd.f32 %v3055_v43, %v1579_v49  ;;  %v1442_v16 = vpop.f32.mrb[39].mxu1  ;;  %v3059_v49 = vld [vmem:[#allocation17_spill] sm:$0xff]  ;;  %v3061_v39 = vld [vmem:[#allocation12_spill] sm:$0xff]  ;;  %v3065_v50 = vld [vmem:[#allocation11_spill] sm:$0xff] }
 0x2b3   :  { %v1554_v28 = vadd.f32 %v2735_v18, %v1552_v48  ;;  %v1752_v41 = vadd.f32 %v2714_v55, %v1750_v27  ;;  %v1715_v25 = vadd.f32 %v3056_v58, %v1713_v40  ;;  %v1616_v44 = vadd.f32 %v2749_v26, %v1614_v12  ;;  %v3067_v48 = vld [vmem:[#allocation13_spill] sm:$0xff]  ;;  %v3069_v57 = vld [vmem:[#allocation27_spill] sm:$0xff] }
 0x2b4   :  { %v1519_v47 = vadd.f32 %v3057_v31, %v1517_v34  ;;  %v1814_v59 = vadd.f32 %v2728_v29, %v1812_v35  ;;  %v1583_v11 = vadd.f32 %v3058_v45, %v1581_v13  ;;  %v1590_v5 = vsel %vm42_vm1, %v1432_v32, 0.0  ;;  %v3068_v40 = vld [vmem:[#allocation21_spill] sm:$0xff]  ;;  %v3070_v34 = vld [vmem:[#allocation28_spill] sm:$0xff]  ;;  %v3071_v35 = vld [vmem:[#allocation15_spill] sm:$0xff] }
 0x2b5   :  { %v1556_v62 = vadd.f32 %v2787_v19, %v1554_v28  ;;  %v1754_v24 = vadd.f32 %v3059_v49, %v1752_v41  ;;  %v1717_v18 = vadd.f32 %v3060_v6, %v1715_v25  ;;  %v1618_v55 = vadd.f32 %v2801_v21, %v1616_v44  ;;  %v2192_v63 = vpop.f32.mrb[40].mxu1  ;;  %v3063_v19 = vld [vmem:[#allocation8_spill] sm:$0xff] }
 0x2b6   :  { %v1521_v46 = vadd.f32 %v3061_v39, %v1519_v47  ;;  %v1816_v26 = vadd.f32 %v2773_v4, %v1814_v59  ;;  %v1585_v8 = vadd.f32 %v3062_v61, %v1583_v11  ;;  %v1691_v29 = vmul.f32 %v1432_v32, %v1432_v32  ;;  %v1452_v54 = vpop.f32.mrb[41].mxu1  ;;  %v3066_v32 = vld [vmem:[#allocation25_spill] sm:$0xff]  ;;  %v3073_v41 = vld [vmem:[#allocation24_spill] sm:$0xff]  ;;  %v3075_v47 = vld [vmem:[#allocation22_spill] sm:$0xff] }
 0x2b7   :  { %v1558_v33 = vadd.f32 %v2814_v7, %v1556_v62  ;;  %v1756_v9 = vadd.f32 %v2790_v51, %v1754_v24  ;;  %v1719_v52 = vadd.f32 %v3063_v19, %v1717_v18  ;;  %v1620_v37 = vadd.f32 %v2827_v22, %v1618_v55  ;;  %v3074_v44 = vld [vmem:[#allocation20_spill] sm:$0xff]  ;;  %v3076_v24 = vld [vmem:[#allocation23_spill] sm:$0xff] }
 0x2b8   :  { %v1523_v3 = vadd.f32 %v3064_v10, %v1521_v46  ;;  %v1818_v21 = vadd.f32 %v2804_v23, %v1816_v26  ;;  %v1587_v56 = vadd.f32 %v2808_v2, %v1585_v8  ;;  %v1781_v4 = vadd.f32 %v3065_v50, %v1779_v0  ;;  %v3072_v0 = vld [vmem:[#allocation18_spill] sm:$0xff] }
 0x2b9   :  { %v1560_v38 = vadd.f32 %v2851_v53, %v1558_v33  ;;  %v1758_v27 = vadd.f32 %v3066_v32, %v1756_v9  ;;  %v1721_v7 = vadd.f32 %v3067_v48, %v1719_v52  ;;  %v1622_v20 = vadd.f32 %v1621_v15, %v1620_v37  ;;  %v2195_v51 = vpop.f32.mrb[42].mxu1  ;;  %v3077_v46 = vld [vmem:[#allocation26_spill] sm:$0xff] }
 0x2ba   :  { %v1525_v12 = vadd.f32 %v3068_v40, %v1523_v3  ;;  %v1820_v22 = vadd.f32 %v3069_v57, %v1818_v21  ;;  %v1589_v17 = vadd.f32 %v3070_v34, %v1587_v56  ;;  %v1783_v23 = vadd.f32 %v3071_v35, %v1781_v4  ;;  %v1462_v43 = vpop.f32.mrb[43].mxu1 }
 0x2bb   :  { %v1760_v2 = vadd.f32 %v2862_v30, %v1758_v27  ;;  %v1723_v13 = vadd.f32 %v3072_v0, %v1721_v7  ;;  %v1790_v53 = vsel %vm42_vm1, %v1691_v29, 0.0  ;;  %v1561_v28 = vsel %vm42_vm1, %v2189_v42, 0.0 }
 0x2bc   :  { %v1527_v15 = vadd.f32 %v3073_v41, %v1525_v12  ;;  %v1822_v58 = vadd.f32 %v1821_v1, %v1820_v22  ;;  %v1591_v25 = vadd.f32 %v1590_v5, %v1589_v17  ;;  %v1785_v31 = vadd.f32 %v3074_v44, %v1783_v23  ;;  %v1504_v44 = vld [vmem:[%s3022_s3 + $0x18] sm:$0xff] }
 0x2bd   :  { %v1725_v59 = vadd.f32 %v3075_v47, %v1723_v13  ;;  %v1562_v45 = vadd.f32 %v1561_v28, %v1560_v38  ;;  %v1694_v11 = vmul.f32 %v2189_v42, %v2189_v42  ;;  %v1530_v62 = vsel %vm42_vm1, %v1442_v16, 0.0  ;;  %v2198_v49 = vpop.f32.mrb[44].mxu1 }
 0x2be   :  { %v1529_v30 = vadd.f32 %v2876_v14, %v1527_v15  ;;  %v1787_v6 = vadd.f32 %v3076_v24, %v1785_v31  ;;  %v1693_v18 = vmul.f32 %v1442_v16, %v1442_v16  ;;  %v1623_v55 = vsel %vm42_vm1, %v2192_v63, 0.0  ;;  %v1472_v39 = vpop.f32.mrb[45].mxu1  ;;  %v1501_v15 = vld [vmem:[%s3022_s3] sm:$0xff] }
 0x2bf   :  { %v1727_v1 = vadd.f32 %v3077_v46, %v1725_v59  ;;  %v1761_v5 = vsel %vm42_vm1, %v1694_v11, 0.0  ;;  %v1624_v26 = vadd.f32 %v1623_v55, %v1622_v20  ;;  %v1696_v61 = vmul.f32 %v2192_v63, %v2192_v63  ;;  %v1638_v59 = vld [vmem:[%s3023_s4 + $0x8] sm:$0xff] }
 0x2c0   :  { %v1789_v8 = vadd.f32 %v2840_v36, %v1787_v6  ;;  %v1762_v42 = vadd.f32 %v1761_v5, %v1760_v2  ;;  %v1531_v29 = vadd.f32 %v1530_v62, %v1529_v30  ;;  %v1730_v33 = vsel %vm42_vm1, %v1693_v18, 0.0  ;;  %v1637_v30 = vld [vmem:[%s3023_s4] sm:$0xff]  ;;  %v1503_v18 = vld [vmem:[%s3022_s3 + $0x10] sm:$0xff] }
 0x2c1   :  { %v1729_v14 = vadd.f32 %v2887_v60, %v1727_v1  ;;  %v1823_v9 = vsel %vm42_vm1, %v1696_v61, 0.0  ;;  %v1592_v16 = vsel %vm42_vm1, %v1452_v54, 0.0  ;;  %v1695_v19 = vmul.f32 %v1452_v54, %v1452_v54  ;;  %v2201_v52 = vpop.f32.mrb[46].mxu1  ;;  %v1640_v61 = vld [vmem:[%s3023_s4 + $0x18] sm:$0xff] }
 0x2c2   :  { %v1791_v37 = vadd.f32 %v1790_v53, %v1789_v8  ;;  %v1824_v10 = vadd.f32 %v1823_v9, %v1822_v58  ;;  %v1593_v3 = vadd.f32 %v1592_v16, %v1591_v25  ;;  %v1563_v21 = vsel %vm42_vm1, %v2195_v51, 0.0  ;;  %v1482_v63 = vpop.f32.mrb[47].mxu1  ;;  %v1639_v9 = vld [vmem:[%s3023_s4 + $0x10] sm:$0xff] }
 0x2c3   :  { %v1731_v56 = vadd.f32 %v1730_v33, %v1729_v14  ;;  %v1792_v36 = vsel %vm42_vm1, %v1695_v19, 0.0  ;;  %v1564_v50 = vadd.f32 %v1563_v21, %v1562_v45  ;;  %v1698_v4 = vmul.f32 %v2195_v51, %v2195_v51 }
 0x2c4   :  { %v1793_v38 = vadd.f32 %v1792_v36, %v1791_v37  ;;  %v1532_v60 = vsel %vm42_vm1, %v1462_v43, 0.0  ;;  %v1697_v32 = vmul.f32 %v1462_v43, %v1462_v43  ;;  %v1625_v27 = vsel %vm42_vm1, %v2198_v49, 0.0  ;;  %v1502_v43 = vld [vmem:[%s3022_s3 + $0x8] sm:$0xff] }
 0x2c5   :  { %v1763_v54 = vsel %vm42_vm1, %v1698_v4, 0.0  ;;  %v1533_v48 = vadd.f32 %v1532_v60, %v1531_v29  ;;  %v1626_v7 = vadd.f32 %v1625_v27, %v1624_v26  ;;  %v1700_v20 = vmul.f32 %v2198_v49, %v2198_v49  ;;  %v2204_v40 = vpop.f32.mrb[48].mxu1 }
 0x2c6   :  { %v1764_v12 = vadd.f32 %v1763_v54, %v1762_v42  ;;  %v1732_v57 = vsel %vm42_vm1, %v1697_v32, 0.0  ;;  %v1594_v22 = vsel %vm42_vm1, %v1472_v39, 0.0  ;;  %v1699_v34 = vmul.f32 %v1472_v39, %v1472_v39  ;;  %v1492_v17 = vpop.f32.mrb[49].mxu1 }
 0x2c7   :  { %v1733_v51 = vadd.f32 %v1732_v57, %v1731_v56  ;;  %v1825_v35 = vsel %vm42_vm1, %v1700_v20, 0.0  ;;  %v1595_v23 = vadd.f32 %v1594_v22, %v1593_v3  ;;  %v1565_v2 = vsel %vm42_vm1, %v2201_v52, 0.0 }
 0x2c8   :  { %v1826_v0 = vadd.f32 %v1825_v35, %v1824_v10  ;;  %v1794_v13 = vsel %vm42_vm1, %v1699_v34, 0.0  ;;  %v1566_v53 = vadd.f32 %v1565_v2, %v1564_v50  ;;  %v1702_v28 = vmul.f32 %v2201_v52, %v2201_v52 }
 0x2c9   :  { %v1795_v41 = vadd.f32 %v1794_v13, %v1793_v38  ;;  %v1534_v58 = vsel %vm42_vm1, %v1482_v63, 0.0  ;;  %v1701_v25 = vmul.f32 %v1482_v63, %v1482_v63  ;;  %v1627_v31 = vsel %vm42_vm1, %v2204_v40, 0.0 }
 0x2ca   :  { %v1630_v47 = vadd.f32 %v1566_v53, %v1502_v43  ;;  %v1765_v45 = vsel %vm42_vm1, %v1702_v28, 0.0  ;;  %v1535_v11 = vadd.f32 %v1534_v58, %v1533_v48  ;;  %v1628_v62 = vadd.f32 %v1627_v31, %v1626_v7 }
 0x2cb   :  { %v1766_v49 = vadd.f32 %v1765_v45, %v1764_v12  ;;  %v1734_v24 = vsel %vm42_vm1, %v1701_v25, 0.0  ;;  %v1704_v6 = vmul.f32 %v2204_v40, %v2204_v40  ;;  %v1596_v55 = vsel %vm42_vm1, %v1492_v17, 0.0 }
 0x2cc   :  { %1634 = vst.msk [vmem:[%s3022_s3 + $0x8] sm:$0xff] %vm42_vm1, %v1630_v47  ;;  %v1629_v39 = vadd.f32 %v1535_v11, %v1501_v15  ;;  %v1735_v46 = vadd.f32 %v1734_v24, %v1733_v51  ;;  %v1632_v1 = vadd.f32 %v1628_v62, %v1504_v44  ;;  %v1597_v5 = vadd.f32 %v1596_v55, %v1595_v23 }
 0x2cd   :  { %v1830_v26 = vadd.f32 %v1766_v49, %v1638_v59  ;;  %v1827_v8 = vsel %vm42_vm1, %v1704_v6, 0.0  ;;  %v1703_v42 = vmul.f32 %v1492_v17, %v1492_v17 }
 0x2ce   :  { %1633 = vst.msk [vmem:[%s3022_s3] sm:$0xff] %vm42_vm1, %v1629_v39  ;;  %v1829_v29 = vadd.f32 %v1735_v46, %v1637_v30  ;;  %1636 = vst.msk [vmem:[%s3022_s3 + $0x18] sm:$0xff] %vm42_vm1, %v1632_v1  ;;  %v1828_v33 = vadd.f32 %v1827_v8, %v1826_v0  ;;  %v1631_v14 = vadd.f32 %v1597_v5, %v1503_v18 }
 0x2cf   :  { %1834 = vst.msk [vmem:[%s3023_s4 + $0x8] sm:$0xff] %vm42_vm1, %v1830_v26  ;;  %v1796_v16 = vsel %vm42_vm1, %v1703_v42, 0.0 }
 0x2d0   :  { %1833 = vst.msk [vmem:[%s3023_s4] sm:$0xff] %vm42_vm1, %v1829_v29  ;;  %v1832_v19 = vadd.f32 %v1828_v33, %v1640_v61  ;;  %1635 = vst.msk [vmem:[%s3022_s3 + $0x10] sm:$0xff] %vm42_vm1, %v1631_v14  ;;  %v1797_v52 = vadd.f32 %v1796_v16, %v1795_v41 }
 0x2d2   :  { %1836 = vst.msk [vmem:[%s3023_s4 + $0x18] sm:$0xff] %vm42_vm1, %v1832_v19  ;;  %v1831_v37 = vadd.f32 %v1797_v52, %v1639_v9 }
 0x2d4   :  { %1835 = vst.msk [vmem:[%s3023_s4 + $0x10] sm:$0xff] %vm42_vm1, %v1831_v37 }

</bundles_post_ra>
